<compile_context>
chip_gen: v7x
topology: tpu7x:2x2x1
jax: 0.10.0
libtpu: 0.0.40
codegen_flags: <defaults>
</compile_context>

<pallas_src>
import math

import jax
import jax.numpy as jnp
from jax.experimental import pallas as pl
from jax.experimental.pallas import tpu as pltpu

MLP_LAYERS = [2, 32, 32, 1]   # same convention as the PyTorch module
IN_CHANNELS = 4               # hard-coded in ValueLayer.__init__
K_PAD = 8                     # MXU-friendly contraction dim (zero-padded 4 -> 8)
CHUNK = 256                   # lanes per in-register compute chunk


def _round_up(x, m):
    return pl.cdiv(x, m) * m


def _value_layer_kernel(x_ref, w1_ref, b1_ref, w2_ref, b2_ref, w3_ref, b3_ref,
                        o_ref, x8_ref):
    w1 = w1_ref[...]          # (H1, 8)  columns 4:8 are zero
    b1 = b1_ref[...]          # (H1, 1)
    w2 = w2_ref[...]          # (H2, H1)
    b2 = b2_ref[...]          # (H2, 1)
    w3 = w3_ref[...]          # (1, H2)
    b3 = b3_ref[0, 0]         # scalar, lives in SMEM

    # Zero the staging buffer once per grid step; the per-chunk stores below
    # only ever touch rows [0, IN_CHANNELS), so rows 4:8 stay zero (the K pad).
    x8_ref[...] = jnp.zeros(x8_ref.shape, x8_ref.dtype)

    n_chunks = x_ref.shape[-1] // CHUNK          # static trip count
    for c in range(n_chunks):                    # static offsets -> free slices
        c0 = c * CHUNK
        slot = c % 2                             # alternate staging slots

        # stage the (4, CHUNK) slice as an (8, CHUNK) zero-K-padded block
        x8_ref[slot, 0:IN_CHANNELS, :] = x_ref[:, c0:c0 + CHUNK]
        x8 = x8_ref[slot]                                              # (8, CHUNK)

        # layer 1 (K zero-padded to 8) -> MXU
        h = jnp.dot(w1, x8, preferred_element_type=jnp.float32)
        h = jnp.maximum(h + b1, 0.0)                                   # (H1, CHUNK)
        # layer 2 (32x32) -> MXU
        h = jnp.dot(w2, h, preferred_element_type=jnp.float32)
        h = jnp.maximum(h + b2, 0.0)                                   # (H2, CHUNK)
        # layer 3 (1-wide output) -> MXU
        out = jnp.dot(w3, h, preferred_element_type=jnp.float32) + b3  # (1, CHUNK)

        o_ref[:, c0:c0 + CHUNK] = out.astype(o_ref.dtype)


def value_layer_forward(x, params, *, max_tile_n=8192):
    """x: (..., 4) float32. Returns the squeezed MLP output, matching PyTorch."""
    assert max_tile_n % CHUNK == 0
    (w1, b1), (w2, b2), (w3, b3) = params
    h1, h2 = w1.shape[0], w2.shape[0]

    lead_shape = x.shape[:-1]
    n = math.prod(lead_shape) if lead_shape else 1

    # Lane tile: multiple of CHUNK, as large as the problem allows (amortizes
    # the ~0.35us per-grid-step overhead).  No forced >=2-step split: on 1-TC
    # chips (v5e/v6e) that only doubles the fixed overhead for small N.
    tile_n = min(max_tile_n, _round_up(n, CHUNK))
    n_pad = _round_up(n, tile_n)

    # Single fused pad+transpose pass (pad N first): channels on sublanes,
    # N on lanes.  Channels are left at 4 in HBM; K padding happens in-kernel.
    x2d = x.reshape(n, IN_CHANNELS)
    xt = jnp.pad(x2d, ((0, n_pad - n), (0, 0))).T          # (4, n_pad)

    # kernel-layout params (weights stay in torch (out, in) orientation)
    w1p = jnp.pad(w1, ((0, 0), (0, K_PAD - IN_CHANNELS)))  # (h1, 8), zero cols
    b1c = b1.reshape(h1, 1)
    b2c = b2.reshape(h2, 1)
    w3r = w3.reshape(1, h2)
    b3s = b3.reshape(1, 1)                                  # scalar, SMEM

    flops = 2 * n_pad * (K_PAD * h1 + h1 * h2 + h2)
    bytes_accessed = 4 * (n_pad * (IN_CHANNELS + 1)
                          + h1 * K_PAD + h1 + h2 * h1 + h2 + h2 + 1)

    out_t = pl.pallas_call(
        _value_layer_kernel,
        out_shape=jax.ShapeDtypeStruct((1, n_pad), x.dtype),
        grid_spec=pltpu.PrefetchScalarGridSpec(
            num_scalar_prefetch=0,
            grid=(n_pad // tile_n,),
            in_specs=[
                pl.BlockSpec((IN_CHANNELS, tile_n), lambda i: (0, i)),   # x tile
                pl.BlockSpec((h1, K_PAD), lambda i: (0, 0)),             # w1 (K-padded)
                pl.BlockSpec((h1, 1), lambda i: (0, 0)),                 # b1 column
                pl.BlockSpec((h2, h1), lambda i: (0, 0)),                # w2 (whole)
                pl.BlockSpec((h2, 1), lambda i: (0, 0)),                 # b2 column
                pl.BlockSpec((1, h2), lambda i: (0, 0)),                 # w3 row
                pl.BlockSpec(memory_space=pltpu.MemorySpace.SMEM),       # b3 scalar
            ],
            out_specs=pl.BlockSpec((1, tile_n), lambda i: (0, i)),
            scratch_shapes=[pltpu.VMEM((2, K_PAD, CHUNK), jnp.float32)],  # K-pad staging
        ),
        compiler_params=pltpu.CompilerParams(
            # TODO(synk): on v7x, consider pltpu.CORE_PARALLEL on this axis and
            # an even grid-step count to balance the two TensorCores.
            dimension_semantics=("parallel",)),
        cost_estimate=pl.CostEstimate(
            flops=flops, transcendentals=0, bytes_accessed=bytes_accessed),
    )(xt, w1p, b1c, w2, b2c, w3r, b3s)

    out = out_t[0, :n].reshape(*lead_shape, 1)
    return jnp.squeeze(out)   # torch .squeeze(): drop all size-1 dims


def init_params(key, mlp_layers=MLP_LAYERS):
    """PyTorch-style params: (weight (out,in), bias (out,)) per nn.Linear,
    uniform +/- 1/sqrt(fan_in) like the torch default."""
    params = []
    fan_in = IN_CHANNELS
    for fan_out in mlp_layers[1:]:
        key, kw, kb = jax.random.split(key, 3)
        bound = 1.0 / math.sqrt(fan_in)
        w = jax.random.uniform(kw, (fan_out, fan_in), jnp.float32, -bound, bound)
        b = jax.random.uniform(kb, (fan_out,), jnp.float32, -bound, bound)
        params.append((w, b))
        fan_in = fan_out
    return params


def value_layer_ref(x, params):
    """Pure-JAX reference (torch-equivalent math) for correctness checks."""
    (w1, b1), (w2, b2), (w3, b3) = params
    h = jnp.maximum(x @ w1.T + b1, 0.0)
    h = jnp.maximum(h @ w2.T + b2, 0.0)
    out = h @ w3.T + b3
    return jnp.squeeze(out)


if __name__ == "__main__":
    key = jax.random.PRNGKey(0)
    kp, kx1, kx2 = jax.random.split(key, 3)
    params = init_params(kp)

    fwd = jax.jit(lambda xx: value_layer_forward(xx, params))

    # case 1: (batch=2, points=128, in_channels=4) -> (2, 128)
    x1 = jax.random.normal(kx1, (2, 128, IN_CHANNELS), dtype=jnp.float32)
    out1 = jax.block_until_ready(fwd(x1))
    ref1 = value_layer_ref(x1, params)
    assert out1.shape == ref1.shape == (2, 128)
    assert jnp.allclose(out1, ref1, atol=1e-3, rtol=1e-3)

    # case 2: ragged N (not a multiple of CHUNK) -> exercises the padded tail
    x2 = jax.random.normal(kx2, (3, 50, IN_CHANNELS), dtype=jnp.float32)
    out2 = jax.block_until_ready(fwd(x2))
    ref2 = value_layer_ref(x2, params)
    assert out2.shape == ref2.shape == (3, 50)
    assert jnp.allclose(out2, ref2, atol=1e-3, rtol=1e-3)

    print("KERNEL_OK")
</pallas_src>

<mosaic_0001>
module attributes {stable_mosaic.version = 11 : i64} {
  func.func @_value_layer_kernel(%arg0: i32, %arg1: memref<4x256xf32, #tpu.memory_space<vmem>>, %arg2: memref<32x8xf32, #tpu.memory_space<vmem>>, %arg3: memref<32x1xf32, #tpu.memory_space<vmem>>, %arg4: memref<32x32xf32, #tpu.memory_space<vmem>>, %arg5: memref<32x1xf32, #tpu.memory_space<vmem>>, %arg6: memref<1x32xf32, #tpu.memory_space<vmem>>, %arg7: memref<1x1xf32, #tpu.memory_space<smem>>, %arg8: memref<1x256xf32, #tpu.memory_space<vmem>>, %arg9: memref<2x8x256xf32, #tpu.memory_space<vmem>>) attributes {dimension_semantics = [#tpu.dimension_semantics<parallel>], iteration_bounds = array<i64: 1>, scalar_prefetch = 0 : i64, scratch_operands = 1 : i64, tpu.core_type = #tpu.core_type<tc>, window_params = [{transform_indices = @transform_0, window_bounds = array<i64: 4, 256>}, {pipeline_mode = #tpu.pipeline_mode<synchronous>, transform_indices = @transform_1, window_bounds = array<i64: 32, 8>}, {pipeline_mode = #tpu.pipeline_mode<synchronous>, transform_indices = @transform_2, window_bounds = array<i64: 32, 1>}, {pipeline_mode = #tpu.pipeline_mode<synchronous>, transform_indices = @transform_3, window_bounds = array<i64: 32, 32>}, {pipeline_mode = #tpu.pipeline_mode<synchronous>, transform_indices = @transform_4, window_bounds = array<i64: 32, 1>}, {pipeline_mode = #tpu.pipeline_mode<synchronous>, transform_indices = @transform_5, window_bounds = array<i64: 1, 32>}, {transform_indices = @transform_6, window_bounds = array<i64: 1, 1>}, {transform_indices = @transform_7, window_bounds = array<i64: 1, 256>}]} {
    %c0 = arith.constant 0 : index
    %c0_0 = arith.constant 0 : index
    %0 = vector.load %arg2[%c0, %c0_0] : memref<32x8xf32, #tpu.memory_space<vmem>>, vector<32x8xf32>
    %c0_1 = arith.constant 0 : index
    %c0_2 = arith.constant 0 : index
    %1 = vector.load %arg3[%c0_1, %c0_2] : memref<32x1xf32, #tpu.memory_space<vmem>>, vector<32x1xf32>
    %c0_3 = arith.constant 0 : index
    %c0_4 = arith.constant 0 : index
    %2 = vector.load %arg4[%c0_3, %c0_4] : memref<32x32xf32, #tpu.memory_space<vmem>>, vector<32x32xf32>
    %c0_5 = arith.constant 0 : index
    %c0_6 = arith.constant 0 : index
    %3 = vector.load %arg5[%c0_5, %c0_6] : memref<32x1xf32, #tpu.memory_space<vmem>>, vector<32x1xf32>
    %c0_7 = arith.constant 0 : index
    %c0_8 = arith.constant 0 : index
    %4 = vector.load %arg6[%c0_7, %c0_8] : memref<1x32xf32, #tpu.memory_space<vmem>>, vector<1x32xf32>
    %c0_9 = arith.constant 0 : index
    %c0_10 = arith.constant 0 : index
    %5 = memref.load %arg7[%c0_9, %c0_10] : memref<1x1xf32, #tpu.memory_space<smem>>
    %cst = arith.constant 0.000000e+00 : f32
    %6 = vector.broadcast %cst : f32 to vector<2x8x256xf32>
    %c0_11 = arith.constant 0 : index
    %c0_12 = arith.constant 0 : index
    %c0_13 = arith.constant 0 : index
    %7 = vector.load %arg9[%c0_11, %c0_12, %c0_13] : memref<2x8x256xf32, #tpu.memory_space<vmem>>, vector<2x8x256xf32>
    tpu.vector_store %arg9[%c0_11, %c0_12, %c0_13], %6 {strides = array<i32>} : memref<2x8x256xf32, #tpu.memory_space<vmem>>, vector<2x8x256xf32>,
    %c0_14 = arith.constant 0 : index
    %c0_15 = arith.constant 0 : index
    %8 = vector.load %arg1[%c0_14, %c0_15] : memref<4x256xf32, #tpu.memory_space<vmem>>, vector<4x256xf32>
    %c0_16 = arith.constant 0 : index
    %c0_17 = arith.constant 0 : index
    %c0_18 = arith.constant 0 : index
    %9 = vector.load %arg9[%c0_16, %c0_17, %c0_18] : memref<2x8x256xf32, #tpu.memory_space<vmem>>, vector<1x4x256xf32>
    %10 = vector.shape_cast %9 : vector<1x4x256xf32> to vector<4x256xf32>
    %11 = vector.shape_cast %8 : vector<4x256xf32> to vector<1x4x256xf32>
    tpu.vector_store %arg9[%c0_16, %c0_17, %c0_18], %11 {strides = array<i32>} : memref<2x8x256xf32, #tpu.memory_space<vmem>>, vector<1x4x256xf32>,
    %c0_19 = arith.constant 0 : index
    %c0_20 = arith.constant 0 : index
    %c0_21 = arith.constant 0 : index
    %12 = vector.load %arg9[%c0_19, %c0_20, %c0_21] : memref<2x8x256xf32, #tpu.memory_space<vmem>>, vector<1x8x256xf32>
    %13 = vector.shape_cast %12 : vector<1x8x256xf32> to vector<8x256xf32>
    %cst_22 = arith.constant dense<0.000000e+00> : vector<32x256xf32>
    %14 = tpu.matmul %0, %13, %cst_22 {dimension_numbers = #tpu.dot_dimension_numbers<[1], [0], [0], [1], [0, 0, 1, 1], [], []>} : vector<32x8xf32>, vector<8x256xf32>, vector<32x256xf32> -> vector<32x256xf32>
    %15 = vector.broadcast %1 : vector<32x1xf32> to vector<32x256xf32>
    %16 = arith.addf %14, %15 : vector<32x256xf32>
    %cst_23 = arith.constant 0.000000e+00 : f32
    %17 = vector.broadcast %cst_23 : f32 to vector<32x256xf32>
    %18 = arith.maximumf %16, %17 : vector<32x256xf32>
    %cst_24 = arith.constant dense<0.000000e+00> : vector<32x256xf32>
    %19 = tpu.matmul %2, %18, %cst_24 {dimension_numbers = #tpu.dot_dimension_numbers<[1], [0], [0], [1], [0, 0, 1, 1], [], []>} : vector<32x32xf32>, vector<32x256xf32>, vector<32x256xf32> -> vector<32x256xf32>
    %20 = vector.broadcast %3 : vector<32x1xf32> to vector<32x256xf32>
    %21 = arith.addf %19, %20 : vector<32x256xf32>
    %cst_25 = arith.constant 0.000000e+00 : f32
    %22 = vector.broadcast %cst_25 : f32 to vector<32x256xf32>
    %23 = arith.maximumf %21, %22 : vector<32x256xf32>
    %cst_26 = arith.constant dense<0.000000e+00> : vector<1x256xf32>
    %24 = tpu.matmul %4, %23, %cst_26 {dimension_numbers = #tpu.dot_dimension_numbers<[1], [0], [0], [1], [0, 0, 1, 1], [], []>} : vector<1x32xf32>, vector<32x256xf32>, vector<1x256xf32> -> vector<1x256xf32>
    %25 = vector.broadcast %5 : f32 to vector<1x256xf32>
    %26 = arith.addf %24, %25 : vector<1x256xf32>
    %c0_27 = arith.constant 0 : index
    %c0_28 = arith.constant 0 : index
    %27 = vector.load %arg8[%c0_27, %c0_28] : memref<1x256xf32, #tpu.memory_space<vmem>>, vector<1x256xf32>
    tpu.vector_store %arg8[%c0_27, %c0_28], %26 {strides = array<i32>} : memref<1x256xf32, #tpu.memory_space<vmem>>, vector<1x256xf32>,
    return
  }
  func.func @transform_0(%arg0: i32) -> (i32, i32) {
    %c0_i32 = arith.constant 0 : i32
    %c0_i32_0 = arith.constant 0 : i32
    return %c0_i32, %arg0 : i32, i32
  }
  func.func @transform_1(%arg0: i32) -> (i32, i32) {
    %c0_i32 = arith.constant 0 : i32
    %c0_i32_0 = arith.constant 0 : i32
    %c0_i32_1 = arith.constant 0 : i32
    return %c0_i32, %c0_i32_0 : i32, i32
  }
  func.func @transform_2(%arg0: i32) -> (i32, i32) {
    %c0_i32 = arith.constant 0 : i32
    %c0_i32_0 = arith.constant 0 : i32
    %c0_i32_1 = arith.constant 0 : i32
    return %c0_i32, %c0_i32_0 : i32, i32
  }
  func.func @transform_3(%arg0: i32) -> (i32, i32) {
    %c0_i32 = arith.constant 0 : i32
    %c0_i32_0 = arith.constant 0 : i32
    %c0_i32_1 = arith.constant 0 : i32
    return %c0_i32, %c0_i32_0 : i32, i32
  }
  func.func @transform_4(%arg0: i32) -> (i32, i32) {
    %c0_i32 = arith.constant 0 : i32
    %c0_i32_0 = arith.constant 0 : i32
    %c0_i32_1 = arith.constant 0 : i32
    return %c0_i32, %c0_i32_0 : i32, i32
  }
  func.func @transform_5(%arg0: i32) -> (i32, i32) {
    %c0_i32 = arith.constant 0 : i32
    %c0_i32_0 = arith.constant 0 : i32
    %c0_i32_1 = arith.constant 0 : i32
    return %c0_i32, %c0_i32_0 : i32, i32
  }
  func.func @transform_6(%arg0: i32) -> (i32, i32) {
    %c0_i32 = arith.constant 0 : i32
    %c0_i32_0 = arith.constant 0 : i32
    %c0_i32_1 = arith.constant 0 : i32
    return %c0_i32, %c0_i32_0 : i32, i32
  }
  func.func @transform_7(%arg0: i32) -> (i32, i32) {
    %c0_i32 = arith.constant 0 : i32
    %c0_i32_0 = arith.constant 0 : i32
    return %c0_i32, %arg0 : i32, i32
  }
}

</mosaic_0001>

<bundles_post_ra>
// kernel: _lambda_.1
= control target key start
LH: loop header
LB: loop body
LE: loop exit
PB: predicated region body
PF: predicated region fallthrough
CT: control target
= control target key end

     0   :  { %13 = vsyncpa [#allocation5], 0  ;;  %s839_s0 = inlined_call_operand.hbm [shape: f32[4,256], index: 0, kind: input, shape index: {}]   ;;  %s840_s1 = inlined_call_operand.hbm [shape: f32[32,8], index: 1, kind: input, shape index: {}]   ;;  %s841_s2 = inlined_call_operand.hbm [shape: f32[32,1], index: 2, kind: input, shape index: {}]   ;;  %s842_s3 = inlined_call_operand.hbm [shape: f32[32,32], index: 3, kind: input, shape index: {}]   ;;  %s843_s4 = inlined_call_operand.hbm [shape: f32[32,1], index: 4, kind: input, shape index: {}]   ;;  %s844_s5 = inlined_call_operand.vmem [shape: f32[1,32], index: 5, kind: input, shape index: {}]   ;;  %s845_s6 = inlined_call_operand.<no memory space> [shape: f32[1,1], index: 6, kind: input, shape index: {}]   ;;  %s846_s7 = inlined_call_operand.hbm [shape: f32[1,256], index: 7, kind: output, shape index: {}]  }
   0x1   :  { %14 = vsyncpa [#allocation8], 0 }
   0x2   :  { %15 = vsyncpa [#allocation11], 0 }
   0x3   :  { %16 = vsyncpa [#allocation6], 0  ;;  %s678_s24 = smov [#allocation7]   ;;  %s538_s28 = scalar_lea.hbm %s840_s1, 512 }
   0x4   :  { %s32_s25 = sshll.u32 %s678_s24, 4  ;;  %p539_p0 = scmp.ne.s32.totalorder %s840_s1, %s538_s28  ;;  %s33_s25 = int_to_ptr.vmem [resolvable:$true] %s32_s25 }
   0x5   :  { %p542_p1 = scmp.lt.u32.totalorder %s538_s28, %s840_s1 }
   0x7   :  { %p544_p2 = pnand %p542_p1, %p539_p0 }
   0x9   :  { %547 = shalt.err (!%p544_p2)
}
   0xa   :  { %s548_s10 = scalar_lea.vmem %s33_s25, 512  ;;  %p553_p4 = scmp.lt.s32.totalorder %s33_s25, %s33_s25 }
   0xb   :  { %p549_p3 = scmp.ne.s32.totalorder %s33_s25, %s548_s10  ;;  %p554_p5 = scmp.lt.s32.totalorder %s548_s10, %s548_s10 }
   0xd   :  { %p555_p6 = por %p554_p5, %p553_p4 }
   0xf   :  { %p556_p7 = pnand %p555_p6, %p549_p3 }
  0x11   :  { %559 = shalt.err (!%p556_p7)
}
  0x12   :  { %s679_s11 = smov 128   ;;  %s680_s12 = smov 8  }
  0x13   :  { %38 = dma.hbm_to_vmem [thread:$0]  %s840_s1, 512, %s33_s25, [#allocation8], %s679_s11, %s679_s11, %s680_s12  }
  0x14   :  { %s681_s15 = smov [#allocation10]   ;;  %s682_s17 = smov [#allocation4]  }
  0x15   :  { %s56_s16 = sshll.u32 %s681_s15, 4  ;;  %s23_s18 = sshll.u32 %s682_s17, 4  ;;  %s57_s16 = int_to_ptr.vmem [resolvable:$true] %s56_s16  ;;  %s24_s18 = int_to_ptr.vmem [resolvable:$true] %s23_s18 }
  0x16   :  { %s560_s21 = scalar_lea.hbm %s842_s3, 512 }
  0x17   :  { %p561_p8 = scmp.ne.s32.totalorder %s842_s3, %s560_s21  ;;  %p564_p9 = scmp.lt.u32.totalorder %s560_s21, %s842_s3 }
  0x19   :  { %p566_p10 = pnand %p564_p9, %p561_p8 }
  0x1b   :  { %569 = shalt.err (!%p566_p10)
}
  0x1c   :  { %s570_s1 = scalar_lea.vmem %s57_s16, 512  ;;  %p575_p12 = scmp.lt.s32.totalorder %s57_s16, %s57_s16 }
  0x1d   :  { %p571_p11 = scmp.ne.s32.totalorder %s57_s16, %s570_s1  ;;  %p576_p13 = scmp.lt.s32.totalorder %s570_s1, %s570_s1 }
  0x1f   :  { %p577_p0 = por %p576_p13, %p575_p12 }
  0x21   :  { %p578_p1 = pnand %p577_p0, %p571_p11 }
  0x23   :  { %581 = shalt.err (!%p578_p1)
}
  0x24   :  { %62 = dma.hbm_to_vmem [thread:$0]  %s842_s3, 512, %s57_s16, [#allocation11], %s679_s11, %s679_s11, %s680_s12  }
  0x25   :  { %s582_s30 = scalar_lea.hbm %s839_s0, 128 }
  0x26   :  { %p583_p2 = scmp.ne.s32.totalorder %s839_s0, %s582_s30  ;;  %p586_p3 = scmp.lt.u32.totalorder %s582_s30, %s839_s0 }
  0x28   :  { %p588_p4 = pnand %p586_p3, %p583_p2 }
  0x2a   :  { %591 = shalt.err (!%p588_p4)
}
  0x2b   :  { %s592_s14 = scalar_lea.vmem %s24_s18, 128  ;;  %p597_p6 = scmp.lt.s32.totalorder %s24_s18, %s24_s18 }
  0x2c   :  { %p593_p5 = scmp.ne.s32.totalorder %s24_s18, %s592_s14  ;;  %p598_p7 = scmp.lt.s32.totalorder %s592_s14, %s592_s14 }
  0x2e   :  { %p599_p8 = por %p598_p7, %p597_p6 }
  0x30   :  { %p600_p9 = pnand %p599_p8, %p593_p5 }
  0x32   :  { %603 = shalt.err (!%p600_p9)
}
  0x33   :  { %26 = dma.hbm_to_vmem [thread:$0]  %s839_s0, 128, %s24_s18, [#allocation5]  }
  0x34   :  { %s683_s16 = smov [#allocation9]   ;;  %s684_s19 = smov [#allocation12]  }
  0x35   :  { %s44_s17 = sshll.u32 %s683_s16, 4  ;;  %s68_s20 = sshll.u32 %s684_s19, 4  ;;  %s45_s17 = int_to_ptr.vmem [resolvable:$true] %s44_s17  ;;  %s69_s20 = int_to_ptr.vmem [resolvable:$true] %s68_s20 }
  0x36   :  { %s604_s23 = scalar_lea.hbm %s841_s2, 512 }
  0x37   :  { %p605_p10 = scmp.ne.s32.totalorder %s841_s2, %s604_s23  ;;  %p608_p11 = scmp.lt.u32.totalorder %s604_s23, %s841_s2 }
  0x39   :  { %p610_p12 = pnand %p608_p11, %p605_p10 }
  0x3b   :  { %613 = shalt.err (!%p610_p12)
}
  0x3c   :  { %s614_s0 = scalar_lea.vmem %s45_s17, 512  ;;  %p619_p0 = scmp.lt.s32.totalorder %s45_s17, %s45_s17 }
  0x3d   :  { %p615_p13 = scmp.ne.s32.totalorder %s45_s17, %s614_s0  ;;  %p620_p1 = scmp.lt.s32.totalorder %s614_s0, %s614_s0 }
  0x3f   :  { %p621_p2 = por %p620_p1, %p619_p0 }
  0x41   :  { %p622_p3 = pnand %p621_p2, %p615_p13 }
  0x43   :  { %625 = shalt.err (!%p622_p3)
}
  0x44   :  { %50 = dma.hbm_to_vmem [thread:$0]  %s841_s2, 512, %s45_s17, [#allocation8], %s679_s11, %s679_s11, %s680_s12  }
  0x45   :  { %s626_s30 = scalar_lea.hbm %s843_s4, 512 }
  0x46   :  { %p627_p4 = scmp.ne.s32.totalorder %s843_s4, %s626_s30  ;;  %p630_p5 = scmp.lt.u32.totalorder %s626_s30, %s843_s4 }
  0x48   :  { %p632_p6 = pnand %p630_p5, %p627_p4 }
  0x4a   :  { %635 = shalt.err (!%p632_p6)
}
  0x4b   :  { %s636_s14 = scalar_lea.vmem %s69_s20, 512  ;;  %p641_p8 = scmp.lt.s32.totalorder %s69_s20, %s69_s20 }
  0x4c   :  { %p637_p7 = scmp.ne.s32.totalorder %s69_s20, %s636_s14  ;;  %p642_p9 = scmp.lt.s32.totalorder %s636_s14, %s636_s14 }
  0x4e   :  { %p643_p10 = por %p642_p9, %p641_p8 }
  0x50   :  { %p644_p11 = pnand %p643_p10, %p637_p7 }
  0x52   :  { %647 = shalt.err (!%p644_p11)
}
  0x53   :  { %74 = dma.hbm_to_vmem [thread:$0]  %s843_s4, 512, %s69_s20, [#allocation11], %s679_s11, %s679_s11, %s680_s12  }
  0x54   :  { %670 = dma.done.wait [#allocation5], 128  }
  0x55   :  { %671 = vsyncadd [#allocation5], 4294967168 }
  0x56   :  { %672 = dma.done.wait [#allocation8], 1024  }
  0x57   :  { %673 = vsyncadd [#allocation8], 4294966272 }
  0x58   :  { %674 = dma.done.wait [#allocation11], 1024  }
  0x59   :  { %675 = vsyncadd [#allocation11], 4294966272  ;;  %v685_v0 = vmov 0.0   ;;  %v686_v1 = vmov 0   ;;  %v116_v2 = vld [vmem:[#allocation4] sm:$0xff]  ;;  %v98_v4 = vld [vmem:[#allocation9] sm:$0xff] }
  0x5a   :  { %113 = vst [vmem:[#allocation2 + $0x8] sm:$0xff] %v685_v0  ;;  %112 = vst [vmem:[#allocation2] sm:$0xff] %v685_v0  ;;  %221 = vmatprep.mubr.f32.mxu0 %v685_v0  ;;  %535 = vset.pattern.permute.xlu0 %v686_v1  ;;  %v118_v3 = vcombine.high %v116_v2, %v116_v2  ;;  %v100_v5 = vld [vmem:[#allocation9 + $0x10] sm:$0xff]  ;;  %v99_v6 = vld [vmem:[#allocation9 + $0x8] sm:$0xff]  ;;  %vm144_vm0 = vcmask 64512   ;;  %vm274_vm1 = vcmask 261120  }
  0x5b   :  { %536 = vset.pattern.permute.xlu1 %v686_v1  ;;  %351 = vmatprep.mubr.f32.mxu1 %v685_v0  ;;  %120 = vst [vmem:[#allocation2] sm:$0xf] %v116_v2  ;;  %v101_v7 = vld [vmem:[#allocation9 + $0x18] sm:$0xff]  ;;  %v106_v8 = vld [vmem:[#allocation12] sm:$0xff]  ;;  %v107_v9 = vld [vmem:[#allocation12 + $0x8] sm:$0xff]  ;;  %s688_s16 = smov [#allocation13]  }
  0x5c   :  { %126 = vperm.xlu0 %535, %v98_v4   ;;  %121 = vst [vmem:[#allocation2 + $0x8] sm:$0xf] %v118_v3  ;;  %136 = vperm.xlu1 %536, %v100_v5   ;;  %v94_v12 = vld [vmem:[#allocation7] sm:$0xff]  ;;  %v108_v13 = vld [vmem:[#allocation12 + $0x10] sm:$0xff]  ;;  %v109_v14 = vld [vmem:[#allocation12 + $0x18] sm:$0xff]  ;;  %s488_s17 = sshll.u32 %s688_s16, 4  ;;  %s489_s17 = int_to_ptr.vmem [resolvable:$true] %s488_s17 }
  0x5d   :  { %v95_v15 = vld [vmem:[#allocation7 + $0x8] sm:$0xff]  ;;  %v96_v16 = vld [vmem:[#allocation7 + $0x10] sm:$0xff]  ;;  %v97_v17 = vld [vmem:[#allocation7 + $0x18] sm:$0xff]  ;;  %p653_p13 = scmp.lt.s32.totalorder %s489_s17, %s489_s17 }
  0x5e   :  { %v102_v50 = vld [vmem:[#allocation10] sm:$0xff]  ;;  %v103_v51 = vld [vmem:[#allocation10 + $0x8] sm:$0xff]  ;;  %v104_v52 = vld [vmem:[#allocation10 + $0x10] sm:$0xff] }
  0x5f   :  { %v105_v53 = vld [vmem:[#allocation10 + $0x18] sm:$0xff] }
  0x60   :  { %131 = vperm.xlu0 %535, %v99_v6   ;;  %141 = vperm.xlu1 %536, %v101_v7  }
  0x62   :  { %v122_v10 = vld [vmem:[#allocation2] sm:$0xff] }
  0x63   :  { %v123_v11 = vld [vmem:[#allocation2 + $0x8] sm:$0xff] }
  0x64   :  { %256 = vperm.xlu0 %535, %v106_v8   ;;  %157 = vmatprep.subr.mxu0 %v123_v11 }
  0x65   :  { %261 = vperm.xlu1 %536, %v107_v9   ;;  %158 = vmatpush1.msra.mxu0 %v122_v10 }
  0x66   :  { %499 = vmatmul.mubr.msk.f32.vlgmr.msra.gmra.mrb[0].mxu0 %vm144_vm0, %v94_v12 }
  0x67   :  { %227 = vmatprep.mubr.f32.mxu0 %v685_v0 }
  0x68   :  { %266 = vperm.xlu0 %535, %v108_v13  }
  0x69   :  { %271 = vperm.xlu1 %536, %v109_v14  }
  0x6a   :  { %500 = vmatmul.mubr.msk.f32.gmra.mrb[2].mxu0 %vm144_vm0, %v95_v15 }
  0x6b   :  { %233 = vmatprep.mubr.f32.mxu0 %v685_v0 }
  0x6e   :  { %501 = vmatmul.mubr.msk.f32.gmra.mrb[4].mxu0 %vm144_vm0, %v96_v16 }
  0x6f   :  { %239 = vmatprep.mubr.f32.mxu0 %v685_v0 }
  0x72   :  { %502 = vmatmul.mubr.msk.f32.gmra.mrb[6].mxu0 %vm144_vm0, %v97_v17 }
  0x73   :  { %452 = vmatprep.mubr.f32.mxu0 %v685_v0 }
  0xdb   :  { %v127_v18 = vpop.permute.xlu0 %126  ;;  %v137_v27 = vpop.permute.xlu1 %136 }
  0xdf   :  { %v132_v22 = vpop.permute.xlu0 %131  ;;  %v142_v38 = vpop.permute.xlu1 %141 }
  0xe3   :  { %v257_v56 = vpop.permute.xlu0 %256 }
  0xe4   :  { %v262_v58 = vpop.permute.xlu1 %261 }
  0xe7   :  { %v267_v7 = vpop.permute.xlu0 %266 }
  0xe8   :  { %v272_v10 = vpop.permute.xlu1 %271 }
 0x139   :  { %v223_v19 = vpop.f32.mrb[0].mxu0 }
 0x13a   :  { %v225_v20 = vpop.f32.mrb[1].mxu0  ;;  %v224_v21 = vadd.f32 %v223_v19, %v127_v18 }
 0x13b   :  { %v226_v23 = vadd.f32 %v225_v20, %v127_v18 }
 0x13c   :  { %v246_v29 = vmax.f32 %v224_v21, 0.0 }
 0x13d   :  { %v229_v24 = vpop.f32.mrb[2].mxu0  ;;  %v247_v31 = vmax.f32 %v226_v23, 0.0  ;;  %v687_v23 = vmov 1966171168  }
 0x13e   :  { %v230_v25 = vadd.f32 %v229_v24, %v132_v22  ;;  %v231_v26 = vpop.f32.mrb[3].mxu0  ;;  %v463_v24 = vunpack.c.l.s4 %v687_v23 }
 0x13f   :  { %v232_v28 = vadd.f32 %v231_v26, %v132_v22  ;;  %v110_v22 = vld [vmem:[%s844_s5] sm:$0x1]  ;;  %v384_v26 = vstv %s845_s6  ;;  %s648_s5 = scalar_lea.vmem %s489_s17, 32 }
 0x140   :  { %v248_v30 = vmax.f32 %v230_v25, 0.0  ;;  %v465_v25 = vlaneseq  ;;  %p649_p12 = scmp.ne.s32.totalorder %s489_s17, %s648_s5  ;;  %p654_p0 = scmp.lt.s32.totalorder %s648_s5, %s648_s5 }
 0x141   :  { %v249_v32 = vmax.f32 %v232_v28, 0.0  ;;  %v235_v33 = vpop.f32.mrb[4].mxu0 }
 0x142   :  { %v237_v34 = vpop.f32.mrb[5].mxu0  ;;  %v510_v35 = vpack.c.bf16 %v248_v30, %v246_v29  ;;  %v236_v37 = vadd.f32 %v235_v33, %v137_v27  ;;  %v466_v28 = vshrl.u32 %v465_v25, 7  ;;  %vm479_vm2 = vcmp.lt.s32.totalorder %v465_v25, 256  ;;  %p655_p1 = por %p654_p0, %p653_p13 }
 0x143   :  { %v508_v36 = vpack.c.bf16 %v249_v32, %v247_v31  ;;  %v238_v39 = vadd.f32 %v237_v34, %v137_v27  ;;  %v464_v27 = vunpack.c.0.s8 %v463_v24 }
 0x144   :  { %v250_v44 = vmax.f32 %v236_v37, 0.0  ;;  %p656_p2 = pnand %p655_p1, %p649_p12 }
 0x145   :  { %v241_v40 = vpop.f32.mrb[6].mxu0  ;;  %509 = vmatprep.subr.bf16.mxu1 %v508_v36  ;;  %v251_v46 = vmax.f32 %v238_v39, 0.0  ;;  %v467_v33 = vsub.s32 %v464_v27, %v466_v28 }
 0x146   :  { %v242_v41 = vadd.f32 %v241_v40, %v142_v38  ;;  %v243_v42 = vpop.f32.mrb[7].mxu0  ;;  %511 = vmatpush1.bf16.msra.mxu1 %v510_v35 }
 0x147   :  { %v244_v43 = vadd.f32 %v243_v42, %v142_v38 }
 0x148   :  { %v252_v45 = vmax.f32 %v242_v41, 0.0 }
 0x149   :  { %v253_v47 = vmax.f32 %v244_v43, 0.0 }
 0x14a   :  { %v514_v48 = vpack.c.bf16 %v252_v45, %v250_v44 }
 0x14b   :  { %v512_v49 = vpack.c.bf16 %v253_v47, %v251_v46 }
 0x14d   :  { %513 = vmatprep.subr.bf16.mxu1 %v512_v49 }
 0x14e   :  { %515 = vmatpush1.bf16.msra.mxu1 %v514_v48 }
 0x151   :  { %503 = vmatmul.mubr.msk.f32.vlgmr.msra.gmra.mrb[0].mxu1 %vm274_vm1, %v102_v50 }
 0x152   :  { %357 = vmatprep.mubr.f32.mxu1 %v685_v0 }
 0x155   :  { %504 = vmatmul.mubr.msk.f32.gmra.mrb[2].mxu1 %vm274_vm1, %v103_v51 }
 0x156   :  { %363 = vmatprep.mubr.f32.mxu1 %v685_v0 }
 0x159   :  { %505 = vmatmul.mubr.msk.f32.gmra.mrb[4].mxu1 %vm274_vm1, %v104_v52 }
 0x15a   :  { %369 = vmatprep.mubr.f32.mxu1 %v685_v0 }
 0x15d   :  { %506 = vmatmul.mubr.msk.f32.gmra.mrb[6].mxu1 %vm274_vm1, %v105_v53 }
 0x224   :  { %v353_v54 = vpop.f32.mrb[0].mxu1 }
 0x225   :  { %v355_v55 = vpop.f32.mrb[1].mxu1  ;;  %v354_v57 = vadd.f32 %v353_v54, %v257_v56 }
 0x226   :  { %v356_v59 = vadd.f32 %v355_v55, %v257_v56 }
 0x227   :  { %v376_v1 = vmax.f32 %v354_v57, 0.0 }
 0x228   :  { %v359_v60 = vpop.f32.mrb[2].mxu1  ;;  %v377_v3 = vmax.f32 %v356_v59, 0.0 }
 0x229   :  { %v360_v61 = vadd.f32 %v359_v60, %v262_v58  ;;  %v361_v62 = vpop.f32.mrb[3].mxu1 }
 0x22a   :  { %v362_v63 = vadd.f32 %v361_v62, %v262_v58 }
 0x22b   :  { %v378_v2 = vmax.f32 %v360_v61, 0.0 }
 0x22c   :  { %v379_v4 = vmax.f32 %v362_v63, 0.0  ;;  %v365_v5 = vpop.f32.mrb[4].mxu1 }
 0x22d   :  { %v518_v6 = vpack.c.bf16 %v378_v2, %v376_v1  ;;  %v367_v0 = vpop.f32.mrb[5].mxu1  ;;  %v366_v9 = vadd.f32 %v365_v5, %v267_v7 }
 0x22e   :  { %v516_v8 = vpack.c.bf16 %v379_v4, %v377_v3  ;;  %v368_v11 = vadd.f32 %v367_v0, %v267_v7 }
 0x22f   :  { %v380_v16 = vmax.f32 %v366_v9, 0.0 }
 0x230   :  { %v371_v12 = vpop.f32.mrb[6].mxu1  ;;  %517 = vmatprep.subr.bf16.mxu0 %v516_v8  ;;  %v381_v18 = vmax.f32 %v368_v11, 0.0 }
 0x231   :  { %v372_v13 = vadd.f32 %v371_v12, %v272_v10  ;;  %v373_v14 = vpop.f32.mrb[7].mxu1  ;;  %519 = vmatpush1.bf16.msra.mxu0 %v518_v6 }
 0x232   :  { %v374_v15 = vadd.f32 %v373_v14, %v272_v10 }
 0x233   :  { %v382_v17 = vmax.f32 %v372_v13, 0.0 }
 0x234   :  { %v383_v19 = vmax.f32 %v374_v15, 0.0 }
 0x235   :  { %v522_v20 = vpack.c.bf16 %v382_v17, %v380_v16 }
 0x236   :  { %v520_v21 = vpack.c.bf16 %v383_v19, %v381_v18 }
 0x238   :  { %521 = vmatprep.subr.bf16.mxu0 %v520_v21 }
 0x239   :  { %523 = vmatpush1.bf16.msra.mxu0 %v522_v20 }
 0x23c   :  { %507 = vmatmul.mubr.msk.f32.vlgmr.msra.gmra.mrb[8].mxu0 %vm274_vm1, %v110_v22 }
 0x30f   :  { %v454_v29 = vpop.f32.mrb[8].mxu0 }
 0x310   :  { %v455_v30 = vadd.f32 %v454_v29, %v384_v26  ;;  %v456_v31 = vpop.f32.mrb[9].mxu0 }
 0x311   :  { %v457_v32 = vadd.f32 %v456_v31, %v384_v26 }
 0x313   :  { %v461_v34 = vcombine.low %v455_v30, %v457_v32 }
 0x315   :  { %v468_v35 = vrot.slane %v461_v34, %v467_v33 }
 0x317   :  { %v475_v36 = vrot.slane %v468_v35, %v467_v33 }
 0x319   :  { %481 = vst.msk [vmem:[#allocation13] sm:$0x3] %vm479_vm2, %v475_v36 }
 0x31a   :  { %659 = shalt.err (!%p656_p2)
}
 0x31b   :  { %s660_s20 = scalar_lea.hbm %s846_s7, 32 }
 0x31c   :  { %p661_p3 = scmp.ne.s32.totalorder %s846_s7, %s660_s20  ;;  %p664_p4 = scmp.lt.u32.totalorder %s660_s20, %s846_s7 }
 0x31e   :  { %p666_p5 = pnand %p664_p4, %p661_p3 }
 0x320   :  { %669 = shalt.err (!%p666_p5)
}
 0x321   :  { %491 = dma.vmem_to_hbm [thread:$0]  %s489_s17, 32, %s846_s7, [#allocation6]  }
 0x322   :  { %676 = dma.done.wait [#allocation6], 32  }
 0x323   :  { %677 = vsyncadd [#allocation6], 4294967264 }
 0x324   :  { %495 = vsyncpa [#allocation5], 1 }
 0x325   :  { %496 = vsyncpa [#allocation8], 1 }
 0x326   :  { %497 = vsyncpa [#allocation11], 1 }
 0x327   :  { %498 = vsyncpa [#allocation6], 1 }

</bundles_post_ra>
